<compile_context>
chip_gen: v6e
topology: v6e:2x2x1
jax: 0.10.0
libtpu: 0.0.40
codegen_flags: <defaults>
</compile_context>

<pallas_src>
import functools

import jax
import jax.numpy as jnp
from jax import lax
from jax.experimental import pallas as pl
from jax.experimental.pallas import tpu as pltpu


def _round_up(x, m):
    return ((x + m - 1) // m) * m


def _dgnet_kernel(*refs, num_layers, is_d):
    """Fused MLP; activations live in transposed (feature, batch) layout.

    refs = (x_ref, w1, b1, w2, b2, ..., wL, bL, out_ref)
      x_ref       : (TB, D_in)      bf16   natural batch-major input tile
      w_l (l<L-1) : (D_out, D_in)   bf16   (pre-transposed in the wrapper)
      w_L  (head) : (D_last, 1)     f32    (VPU reduction, no MXU pass)
      b_l         : (D_out, 1)      f32
      out         : (1, TB)         f32    lane-dense store
    """
    x_ref = refs[0]
    out_ref = refs[-1]
    params = refs[1:-1]

    h = None          # (D_l, TB) bf16 hidden activations
    score = None      # (1, TB)   f32 raw score
    for l in range(num_layers):
        w_ref = params[2 * l]
        b_ref = params[2 * l + 1]
        is_head = (l == num_layers - 1)

        if l == 0:
            # Fold the input transpose into the first MXU matmul:
            # (D_out, D_in) . (TB, D_in)^T -> (D_out, TB); bf16 operands, f32 acc.
            acc = lax.dot_general(
                w_ref[...], x_ref[...],
                dimension_numbers=(((1,), (1,)), ((), ())),
                preferred_element_type=jnp.float32)
        elif is_head:
            # D_out == 1 head: VPU broadcast-multiply + cross-sublane (XLU) sum
            # instead of a wasted M=1 MXU pass. f32 weight & accumulation.
            acc = jnp.sum(w_ref[...] * h, axis=0, keepdims=True)
        else:
            # Hidden layer: bf16 MXU matmul, f32 accumulation.
            acc = jnp.dot(w_ref[...], h, preferred_element_type=jnp.float32)

        acc = acc + b_ref[...]                       # f32 bias add (VPU)

        if is_head:
            score = acc                              # (1, TB) raw score, f32
        else:
            # ReLU (last ReLU is popped in torch); emit bf16 directly for the
            # next MXU layer (cast fuses into the maximum).
            h = jnp.maximum(acc, 0.0).astype(jnp.bfloat16)

    if is_d:
        out_ref[...] = jax.nn.sigmoid(score)         # D-network head (EUP)
    else:
        out_ref[...] = jnp.exp(score)                # G-network: exp(score)


def dg_net_forward(x, weights, biases, is_d=True, *, batch_tile=8192):
    """DG_Net forward as a single Pallas kernel.

    x:       (B, input_size) float32
    weights: list of (D_in, D_out) float32  (torch Linear.weight.T layout)
    biases:  list of (D_out,) or (1, D_out) float32
    returns: (B,) float32   (== torch's y_score.squeeze(1))
    """
    num_layers = len(weights)
    B, d_in = x.shape

    # VMEM guardrail for very large tiles (v7x: 64 MiB physical, 32 MiB scoped).
    batch_tile = min(int(batch_tile), 32768)

    # Batch tiling: multiples of 128 lanes; split into >= 2 grid steps whenever
    # the padded batch allows it so "parallel" shards across v7x's 2 TCs.
    b128 = _round_up(B, 128)
    if b128 <= 128:
        tb = b128
    else:
        tb = min(batch_tile, _round_up(pl.cdiv(b128, 2), 128))
    b_pad = _round_up(B, tb)
    grid = (b_pad // tb,)

    # Natural (B, D_in) layout: no wrapper transpose pass, just a cheap pad and
    # a bf16 cast (the transpose is folded into the first matmul in-kernel).
    x_p = x.astype(jnp.bfloat16)
    if b_pad != B:
        x_p = jnp.pad(x_p, ((0, b_pad - B), (0, 0)))

    # Hidden-layer weights: transposed once to (D_out, D_in) and cast to bf16
    # for the MXU.  The D_out=1 head weight stays f32 (D_last, 1) for the VPU
    # reduction (keeps the score / exp path in f32).
    w_args, b_args = [], []
    for l, (w, b) in enumerate(zip(weights, biases)):
        w = jnp.asarray(w)
        if l == num_layers - 1 and num_layers > 1:
            w_args.append(jnp.reshape(w.astype(jnp.float32), (-1, 1)))
        else:
            w_args.append(jnp.transpose(w).astype(jnp.bfloat16))
        b_args.append(jnp.reshape(jnp.asarray(b, jnp.float32), (-1, 1)))

    args = [x_p]
    in_specs = [pl.BlockSpec((tb, d_in), lambda i: (i, 0))]
    for wt, bc in zip(w_args, b_args):
        args.append(wt)
        args.append(bc)
        # Constant index maps -> weights/biases stay VMEM-resident across steps.
        in_specs.append(pl.BlockSpec(wt.shape, lambda i: (0, 0)))
        in_specs.append(pl.BlockSpec(bc.shape, lambda i: (0, 0)))

    flops = 2 * b_pad * sum(int(w.shape[0]) * int(w.shape[1]) for w in weights)
    bytes_accessed = (
        x_p.size * 2
        + sum(int(w.size) * w.dtype.itemsize for w in w_args)
        + sum(int(b.size) * 4 for b in b_args)
        + b_pad * 4
    )

    kernel = functools.partial(_dgnet_kernel, num_layers=num_layers, is_d=is_d)

    out = pl.pallas_call(
        kernel,
        out_shape=jax.ShapeDtypeStruct((1, b_pad), jnp.float32),
        grid=grid,
        in_specs=in_specs,
        out_specs=pl.BlockSpec((1, tb), lambda i: (0, i)),
        compiler_params=pltpu.CompilerParams(
            dimension_semantics=("parallel",)),   # shards batch grid on v7x's 2 TCs
        cost_estimate=pl.CostEstimate(
            flops=flops, transcendentals=b_pad, bytes_accessed=bytes_accessed),
    )(*args)

    return out[0, :B]   # drop batch padding + squeeze(1)


def init_dg_net_params(key, input_size, hidden_size):
    """Re-implementation of DG_Net.__init__ + init_pars():
    weights ~ Normal(0, 0.1), biases = 0."""
    if not isinstance(hidden_size, (list, tuple)):
        hidden_size = [hidden_size]
    all_s = [input_size] + list(hidden_size) + [1]

    weights, biases = [], []
    for i in range(len(all_s) - 1):
        key, sub = jax.random.split(key)
        w = 0.1 * jax.random.normal(sub, (all_s[i], all_s[i + 1]), dtype=jnp.float32)
        b = jnp.zeros((1, all_s[i + 1]), dtype=jnp.float32)
        weights.append(w)
        biases.append(b)
    return weights, biases


def dg_net_reference(x, weights, biases, is_d=True):
    """Plain-JAX (f32) reference for correctness checking."""
    h = x
    n = len(weights)
    for l, (w, b) in enumerate(zip(weights, biases)):
        h = h @ w + b
        if l < n - 1:
            h = jnp.maximum(h, 0.0)
    h = jax.nn.sigmoid(h) if is_d else jnp.exp(h)
    return h[:, 0]


# TODO(synk): training-side pieces (Adam optimizer, BCELoss, csv logging) are
# not forward-pass ops and are left to standard JAX/optax outside the kernel.

if __name__ == "__main__":
    key = jax.random.PRNGKey(0)

    # Small config consistent with the module: input_size=8, hidden_size=[32, 32]
    batch = 2
    input_size = 8
    hidden_size = [32, 32]

    key, kx, kd, kg = jax.random.split(key, 4)
    x = jax.random.normal(kx, (batch, input_size), dtype=jnp.float32)

    # D-network (is_d=True -> Sigmoid head)
    wd, bd = init_dg_net_params(kd, input_size, hidden_size)
    y_d = dg_net_forward(x, wd, bd, is_d=True)
    jax.block_until_ready(y_d)

    # G-network (is_d=False -> exp of raw score)
    wg, bg = init_dg_net_params(kg, input_size, hidden_size)
    y_g = dg_net_forward(x, wg, bg, is_d=False)
    jax.block_until_ready(y_g)

    # Correctness check against pure-f32 reference (bf16 MXU operands / bf16
    # input -> slightly looser tolerance than exact f32).
    ref_d = dg_net_reference(x, wd, bd, is_d=True)
    ref_g = dg_net_reference(x, wg, bg, is_d=False)
    assert y_d.shape == (batch,) and y_g.shape == (batch,)
    assert jnp.allclose(y_d, ref_d, atol=1e-2, rtol=1e-2)
    assert jnp.allclose(y_g, ref_g, atol=1e-2, rtol=1e-2)

    print("KERNEL_OK")
</pallas_src>

<mosaic_0001>
module attributes {stable_mosaic.version = 11 : i64} {
  func.func @_dgnet_kernel(%arg0: i32, %arg1: memref<128x8xbf16, #tpu.memory_space<vmem>>, %arg2: memref<32x8xbf16, #tpu.memory_space<vmem>>, %arg3: memref<32x1xf32, #tpu.memory_space<vmem>>, %arg4: memref<32x32xbf16, #tpu.memory_space<vmem>>, %arg5: memref<32x1xf32, #tpu.memory_space<vmem>>, %arg6: memref<32x1xf32, #tpu.memory_space<vmem>>, %arg7: memref<1x1xf32, #tpu.memory_space<vmem>>, %arg8: memref<1x128xf32, #tpu.memory_space<vmem>>) attributes {dimension_semantics = [#tpu.dimension_semantics<parallel>], iteration_bounds = array<i64: 1>, scalar_prefetch = 0 : i64, scratch_operands = 0 : i64, tpu.core_type = #tpu.core_type<tc>, window_params = [{transform_indices = @transform_0, window_bounds = array<i64: 128, 8>}, {pipeline_mode = #tpu.pipeline_mode<synchronous>, transform_indices = @transform_1, window_bounds = array<i64: 32, 8>}, {pipeline_mode = #tpu.pipeline_mode<synchronous>, transform_indices = @transform_2, window_bounds = array<i64: 32, 1>}, {pipeline_mode = #tpu.pipeline_mode<synchronous>, transform_indices = @transform_3, window_bounds = array<i64: 32, 32>}, {pipeline_mode = #tpu.pipeline_mode<synchronous>, transform_indices = @transform_4, window_bounds = array<i64: 32, 1>}, {pipeline_mode = #tpu.pipeline_mode<synchronous>, transform_indices = @transform_5, window_bounds = array<i64: 32, 1>}, {pipeline_mode = #tpu.pipeline_mode<synchronous>, transform_indices = @transform_6, window_bounds = array<i64: 1, 1>}, {transform_indices = @transform_7, window_bounds = array<i64: 1, 128>}]} {
    %c0 = arith.constant 0 : index
    %c0_0 = arith.constant 0 : index
    %0 = vector.load %arg2[%c0, %c0_0] : memref<32x8xbf16, #tpu.memory_space<vmem>>, vector<32x8xbf16>
    %c0_1 = arith.constant 0 : index
    %c0_2 = arith.constant 0 : index
    %1 = vector.load %arg1[%c0_1, %c0_2] : memref<128x8xbf16, #tpu.memory_space<vmem>>, vector<128x8xbf16>
    %cst = arith.constant dense<0.000000e+00> : vector<32x128xf32>
    %2 = tpu.matmul %0, %1, %cst {dimension_numbers = #tpu.dot_dimension_numbers<[1], [1], [0], [0], [0, 0, 1, 0], [], []>} : vector<32x8xbf16>, vector<128x8xbf16>, vector<32x128xf32> -> vector<32x128xf32>
    %c0_3 = arith.constant 0 : index
    %c0_4 = arith.constant 0 : index
    %3 = vector.load %arg3[%c0_3, %c0_4] : memref<32x1xf32, #tpu.memory_space<vmem>>, vector<32x1xf32>
    %4 = vector.broadcast %3 : vector<32x1xf32> to vector<32x128xf32>
    %5 = arith.addf %2, %4 : vector<32x128xf32>
    %cst_5 = arith.constant 0.000000e+00 : f32
    %6 = vector.broadcast %cst_5 : f32 to vector<32x128xf32>
    %7 = arith.maximumf %5, %6 : vector<32x128xf32>
    %8 = arith.truncf %7 : vector<32x128xf32> to vector<32x128xbf16>
    %c0_6 = arith.constant 0 : index
    %c0_7 = arith.constant 0 : index
    %9 = vector.load %arg4[%c0_6, %c0_7] : memref<32x32xbf16, #tpu.memory_space<vmem>>, vector<32x32xbf16>
    %cst_8 = arith.constant dense<0.000000e+00> : vector<32x128xf32>
    %10 = tpu.matmul %9, %8, %cst_8 {dimension_numbers = #tpu.dot_dimension_numbers<[1], [0], [0], [1], [0, 0, 1, 1], [], []>} : vector<32x32xbf16>, vector<32x128xbf16>, vector<32x128xf32> -> vector<32x128xf32>
    %c0_9 = arith.constant 0 : index
    %c0_10 = arith.constant 0 : index
    %11 = vector.load %arg5[%c0_9, %c0_10] : memref<32x1xf32, #tpu.memory_space<vmem>>, vector<32x1xf32>
    %12 = vector.broadcast %11 : vector<32x1xf32> to vector<32x128xf32>
    %13 = arith.addf %10, %12 : vector<32x128xf32>
    %cst_11 = arith.constant 0.000000e+00 : f32
    %14 = vector.broadcast %cst_11 : f32 to vector<32x128xf32>
    %15 = arith.maximumf %13, %14 : vector<32x128xf32>
    %16 = arith.truncf %15 : vector<32x128xf32> to vector<32x128xbf16>
    %c0_12 = arith.constant 0 : index
    %c0_13 = arith.constant 0 : index
    %17 = vector.load %arg6[%c0_12, %c0_13] : memref<32x1xf32, #tpu.memory_space<vmem>>, vector<32x1xf32>
    %18 = arith.extf %16 : vector<32x128xbf16> to vector<32x128xf32>
    %19 = vector.broadcast %17 : vector<32x1xf32> to vector<32x128xf32>
    %20 = arith.mulf %19, %18 : vector<32x128xf32>
    %cst_14 = arith.constant dense<0.000000e+00> : vector<128xf32>
    %21 = vector.multi_reduction <add>, %20, %cst_14 [0] : vector<32x128xf32> to vector<128xf32>
    %22 = vector.shape_cast %21 : vector<128xf32> to vector<1x128xf32>
    %c0_15 = arith.constant 0 : index
    %c0_16 = arith.constant 0 : index
    %23 = vector.load %arg7[%c0_15, %c0_16] : memref<1x1xf32, #tpu.memory_space<vmem>>, vector<1x1xf32>
    %24 = vector.broadcast %23 : vector<1x1xf32> to vector<1x128xf32>
    %25 = arith.addf %22, %24 : vector<1x128xf32>
    %26 = arith.negf %25 : vector<1x128xf32>
    %27 = math.exp %26 : vector<1x128xf32>
    %cst_17 = arith.constant 1.000000e+00 : f32
    %28 = vector.broadcast %cst_17 : f32 to vector<1x128xf32>
    %29 = arith.addf %28, %27 : vector<1x128xf32>
    %30 = arith.divf %28, %29 : vector<1x128xf32>
    %c0_18 = arith.constant 0 : index
    %c0_19 = arith.constant 0 : index
    %31 = vector.load %arg8[%c0_18, %c0_19] : memref<1x128xf32, #tpu.memory_space<vmem>>, vector<1x128xf32>
    tpu.vector_store %arg8[%c0_18, %c0_19], %30 {strides = array<i32>} : memref<1x128xf32, #tpu.memory_space<vmem>>, vector<1x128xf32>,
    return
  }
  func.func @transform_0(%arg0: i32) -> (i32, i32) {
    %c0_i32 = arith.constant 0 : i32
    %c0_i32_0 = arith.constant 0 : i32
    return %arg0, %c0_i32 : i32, i32
  }
  func.func @transform_1(%arg0: i32) -> (i32, i32) {
    %c0_i32 = arith.constant 0 : i32
    %c0_i32_0 = arith.constant 0 : i32
    %c0_i32_1 = arith.constant 0 : i32
    return %c0_i32, %c0_i32_0 : i32, i32
  }
  func.func @transform_2(%arg0: i32) -> (i32, i32) {
    %c0_i32 = arith.constant 0 : i32
    %c0_i32_0 = arith.constant 0 : i32
    %c0_i32_1 = arith.constant 0 : i32
    return %c0_i32, %c0_i32_0 : i32, i32
  }
  func.func @transform_3(%arg0: i32) -> (i32, i32) {
    %c0_i32 = arith.constant 0 : i32
    %c0_i32_0 = arith.constant 0 : i32
    %c0_i32_1 = arith.constant 0 : i32
    return %c0_i32, %c0_i32_0 : i32, i32
  }
  func.func @transform_4(%arg0: i32) -> (i32, i32) {
    %c0_i32 = arith.constant 0 : i32
    %c0_i32_0 = arith.constant 0 : i32
    %c0_i32_1 = arith.constant 0 : i32
    return %c0_i32, %c0_i32_0 : i32, i32
  }
  func.func @transform_5(%arg0: i32) -> (i32, i32) {
    %c0_i32 = arith.constant 0 : i32
    %c0_i32_0 = arith.constant 0 : i32
    %c0_i32_1 = arith.constant 0 : i32
    return %c0_i32, %c0_i32_0 : i32, i32
  }
  func.func @transform_6(%arg0: i32) -> (i32, i32) {
    %c0_i32 = arith.constant 0 : i32
    %c0_i32_0 = arith.constant 0 : i32
    %c0_i32_1 = arith.constant 0 : i32
    return %c0_i32, %c0_i32_0 : i32, i32
  }
  func.func @transform_7(%arg0: i32) -> (i32, i32) {
    %c0_i32 = arith.constant 0 : i32
    %c0_i32_0 = arith.constant 0 : i32
    return %c0_i32, %arg0 : i32, i32
  }
}

</mosaic_0001>

<bundles_post_ra>
// kernel: tpu_custom_call.1
= control target key start
LH: loop header
LB: loop body
LE: loop exit
PB: predicated region body
PF: predicated region fallthrough
CT: control target
= control target key end

     0   :  { %s632_s0 = inlined_call_operand.vmem [shape: bf16[128,8], index: 0, kind: input, shape index: {}]   ;;  %s633_s1 = inlined_call_operand.vmem [shape: bf16[32,8], index: 1, kind: input, shape index: {}]   ;;  %s634_s2 = inlined_call_operand.vmem [shape: f32[32,1], index: 2, kind: input, shape index: {}]   ;;  %s635_s3 = inlined_call_operand.vmem [shape: bf16[32,32], index: 3, kind: input, shape index: {}]   ;;  %s636_s4 = inlined_call_operand.vmem [shape: f32[32,1], index: 4, kind: input, shape index: {}]   ;;  %s637_s5 = inlined_call_operand.vmem [shape: f32[32,1], index: 5, kind: input, shape index: {}]   ;;  %s638_s6 = inlined_call_operand.<no memory space> [shape: f32[1,1], index: 6, kind: input, shape index: {}]   ;;  %s639_s7 = inlined_call_operand.hbm [shape: f32[1,128], index: 7, kind: output, shape index: {}]  }
   0x1   :  { %v12_v0 = vstv %s638_s6 }
   0x2   :  { %13 = vst [vmem:[#allocation2] sm:$0x1] %v12_v0 }
   0x3   :  { %v454_v1 = vld [vmem:[%s632_s0 + $0x38] sm:$0xff]   ;;  %vm124_vm0 = vcmask 64512   ;;  %v455_v2 = vld [vmem:[%s632_s0 + $0x30] sm:$0xff]   ;;  %v492_v4 = vmov 0   ;;  %v456_v5 = vld [vmem:[%s632_s0 + $0x28] sm:$0xff]  }
   0x4   :  { %442 = vmatprep.subr.msk.bf16.mxu0 %vm124_vm0, %v454_v1  ;;  %v153_v3 = vsel %vm124_vm0, %v454_v1, 0  ;;  %452 = vset.pattern.permute.xlu0 %v492_v4  ;;  %v150_v6 = vsel %vm124_vm0, %v455_v2, 0  ;;  %v462_v7 = vld [vmem:[%s633_s1] sm:$0xff]   ;;  %v52_v8 = vld [vmem:[%s634_s2 + $0x10] sm:$0xff]  ;;  %v53_v10 = vld [vmem:[%s634_s2 + $0x18] sm:$0xff] }
   0x5   :  { %415 = vmatpush3.bf16.xpose.msra.mxu0 %v153_v3  ;;  %453 = vset.pattern.permute.xlu1 %v492_v4  ;;  %v50_v9 = vld [vmem:[%s634_s2] sm:$0xff]  ;;  %v51_v11 = vld [vmem:[%s634_s2 + $0x8] sm:$0xff] }
   0x6   :  { %443 = vmatprep.subr.msk.bf16.mxu0 %vm124_vm0, %v455_v2  ;;  %430 = vmatprep.mubr.msk.bf16.mxu0 %vm124_vm0, %v462_v7 }
   0x7   :  { %66 = vperm.xlu0 %452, %v52_v8   ;;  %56 = vperm.xlu1 %453, %v50_v9  }
   0xb   :  { %71 = vperm.xlu0 %452, %v53_v10  }
   0xd   :  { %417 = vmatpush3.bf16.xpose.msra.mxu0 %v150_v6 }
   0xe   :  { %444 = vmatprep.subr.msk.bf16.mxu0 %vm124_vm0, %v456_v5 }
   0xf   :  { %14 = vsyncpa [#allocation4], 0  ;;  %v147_v12 = vsel %vm124_vm0, %v456_v5, 0  ;;  %v457_v13 = vld [vmem:[%s632_s0 + $0x20] sm:$0xff]   ;;  %61 = vperm.xlu1 %453, %v51_v11   ;;  %v215_v15 = vld [vmem:[%s636_s4 + $0x8] sm:$0xff]  ;;  %vm248_vm1 = vcmask 261120  }
  0x10   :  { %v214_v14 = vld [vmem:[%s636_s4] sm:$0xff]  ;;  %v216_v16 = vld [vmem:[%s636_s4 + $0x10] sm:$0xff]  ;;  %v217_v17 = vld [vmem:[%s636_s4 + $0x18] sm:$0xff]  ;;  %v144_v18 = vsel %vm124_vm0, %v457_v13, 0 }
  0x11   :  { %220 = vperm.xlu0 %452, %v214_v14   ;;  %v458_v19 = vld [vmem:[%s632_s0 + $0x18] sm:$0xff]   ;;  %v310_v20 = vld [vmem:[%s637_s5] sm:$0xff]  ;;  %v311_v21 = vld [vmem:[%s637_s5 + $0x8] sm:$0xff] }
  0x12   :  { %v312_v22 = vld [vmem:[%s637_s5 + $0x10] sm:$0xff]  ;;  %v313_v23 = vld [vmem:[%s637_s5 + $0x18] sm:$0xff]  ;;  %v141_v24 = vsel %vm124_vm0, %v458_v19, 0  ;;  %v351_v26 = vld [vmem:[#allocation2] sm:$0x1] }
  0x13   :  { %225 = vperm.xlu1 %453, %v215_v15   ;;  %v459_v25 = vld [vmem:[%s632_s0 + $0x10] sm:$0xff]   ;;  %v460_v28 = vld [vmem:[%s632_s0 + $0x8] sm:$0xff]   ;;  %v461_v30 = vld [vmem:[%s632_s0] sm:$0xff]  }
  0x14   :  { %v138_v27 = vsel %vm124_vm0, %v459_v25, 0  ;;  %v135_v29 = vsel %vm124_vm0, %v460_v28, 0  ;;  %v132_v31 = vsel %vm124_vm0, %v461_v30, 0  ;;  %v463_v32 = vld [vmem:[%s633_s1 + $0x8] sm:$0xff]   ;;  %v464_v33 = vld [vmem:[%s635_s3] sm:$0xff]  }
  0x15   :  { %419 = vmatpush3.bf16.xpose.msra.mxu0 %v147_v12  ;;  %230 = vperm.xlu0 %452, %v216_v16   ;;  %v465_v52 = vld [vmem:[%s635_s3 + $0x8] sm:$0xff]   ;;  %s493_s3 = smov [#allocation3]  }
  0x16   :  { %445 = vmatprep.subr.msk.bf16.mxu0 %vm124_vm0, %v457_v13  ;;  %438 = vmatprep.mubr.msk.bf16.mxu1 %vm248_vm1, %v464_v33  ;;  %s375_s21 = sshll.u32 %s493_s3, 4  ;;  %s376_s21 = int_to_ptr.vmem [resolvable:$true] %s375_s21 }
  0x17   :  { %235 = vperm.xlu1 %453, %v217_v17   ;;  %s470_s22 = scalar_lea.vmem %s376_s21, 16  ;;  %s474_s23 = scalar_lea.vmem %s376_s21, 32 }
  0x18   :  { %p471_p0 = scmp.ne.s32.totalorder %s376_s21, %s470_s22  ;;  %p475_p1 = scmp.lt.s32.totalorder %s376_s21, %s376_s21 }
  0x19   :  { %320 = vperm.xlu0 %452, %v310_v20   ;;  %p476_p2 = scmp.lt.s32.totalorder %s474_s23, %s470_s22 }
  0x1b   :  { %325 = vperm.xlu1 %453, %v311_v21   ;;  %v357_v21 = vlaneseq  ;;  %p477_p3 = por %p476_p2, %p475_p1 }
  0x1d   :  { %421 = vmatpush3.bf16.xpose.msra.mxu0 %v144_v18  ;;  %330 = vperm.xlu0 %452, %v312_v22   ;;  %p478_p4 = pnand %p477_p3, %p471_p0 }
  0x1e   :  { %446 = vmatprep.subr.msk.bf16.mxu0 %vm124_vm0, %v458_v19 }
  0x1f   :  { %335 = vperm.xlu1 %453, %v313_v23  }
  0x21   :  { %354 = vperm.xlu0 %452, %v351_v26  }
  0x25   :  { %423 = vmatpush3.bf16.xpose.msra.mxu0 %v141_v24  ;;  %v358_v24 = vshrl.u32 %v357_v21, 7 }
  0x26   :  { %447 = vmatprep.subr.msk.bf16.mxu0 %vm124_vm0, %v459_v25 }
  0x2d   :  { %425 = vmatpush3.bf16.xpose.msra.mxu0 %v138_v27  ;;  %v359_v27 = vsub.s32 0, %v358_v24 }
  0x2e   :  { %448 = vmatprep.subr.msk.bf16.mxu0 %vm124_vm0, %v460_v28 }
  0x35   :  { %427 = vmatpush3.bf16.xpose.msra.mxu0 %v135_v29 }
  0x36   :  { %449 = vmatprep.subr.msk.bf16.mxu0 %vm124_vm0, %v461_v30 }
  0x3d   :  { %429 = vmatpush3.bf16.xpose.msra.mxu0 %v132_v31 }
  0x44   :  { %431 = vmatmul.mubr.msk.bf16.vlgmr.msra.gmra.mxu0 %vm124_vm0, %v463_v32 }
  0x82   :  { %v67_v34 = vpop.permute.xlu0 %66  ;;  %v57_v35 = vpop.permute.xlu1 %56 }
  0x86   :  { %v72_v39 = vpop.permute.xlu0 %71 }
  0x8a   :  { %v62_v43 = vpop.permute.xlu1 %61 }
  0x8c   :  { %v221_v53 = vpop.permute.xlu0 %220 }
  0x8e   :  { %v226_v54 = vpop.permute.xlu1 %225 }
  0x90   :  { %v231_v56 = vpop.permute.xlu0 %230 }
  0x92   :  { %v236_v59 = vpop.permute.xlu1 %235 }
  0x94   :  { %v321_v6 = vpop.permute.xlu0 %320 }
  0x96   :  { %v326_v8 = vpop.permute.xlu1 %325 }
  0x98   :  { %v331_v15 = vpop.permute.xlu0 %330 }
  0x9a   :  { %v336_v18 = vpop.permute.xlu1 %335 }
  0x9c   :  { %v355_v29 = vpop.permute.xlu0 %354 }
  0x9d   :  { %v360_v31 = vrot.slane %v355_v29, %v359_v27 }
 0x104   :  { %v432_v36 = vpop.f32.mrf.mxu0 }
 0x105   :  { %v198_v38 = vadd.f32 %v432_v36, %v67_v34 }
 0x106   :  { %v189_v37 = vpop.f32.mrf.mxu0 }
 0x107   :  { %v190_v41 = vadd.f32 %v189_v37, %v57_v35  ;;  %v206_v45 = vmax.f32 %v198_v38, 0.0 }
 0x108   :  { %v433_v40 = vpop.f32.mrf.mxu0 }
 0x109   :  { %v201_v42 = vadd.f32 %v433_v40, %v72_v39  ;;  %v204_v48 = vmax.f32 %v190_v41, 0.0 }
 0x10a   :  { %v192_v44 = vpop.f32.mrf.mxu0 }
 0x10b   :  { %v207_v46 = vmax.f32 %v201_v42, 0.0  ;;  %v193_v47 = vadd.f32 %v192_v44, %v62_v43 }
 0x10d   :  { %v205_v49 = vmax.f32 %v193_v47, 0.0  ;;  %v209_v50 = vpack.c.bf16 %v207_v46, %v206_v45 }
 0x10f   :  { %v208_v51 = vpack.c.bf16 %v205_v49, %v204_v48  ;;  %434 = vmatprep.subr.bf16.mxu1 %v209_v50 }
 0x110   :  { %435 = vmatpush3.bf16.msra.mxu1 %v209_v50 }
 0x111   :  { %436 = vmatprep.subr.bf16.mxu1 %v208_v51 }
 0x114   :  { %437 = vmatpush3.bf16.msra.mxu1 %v208_v51 }
 0x117   :  { %439 = vmatmul.mubr.msk.bf16.vlgmr.msra.gmra.mxu1 %vm248_vm1, %v465_v52 }
 0x1d7   :  { %v440_v55 = vpop.f32.mrf.mxu1 }
 0x1d8   :  { %v298_v58 = vadd.f32 %v440_v55, %v231_v56 }
 0x1d9   :  { %v289_v57 = vpop.f32.mrf.mxu1 }
 0x1da   :  { %v290_v61 = vadd.f32 %v289_v57, %v221_v53  ;;  %v306_v0 = vmax.f32 %v298_v58, 0.0 }
 0x1db   :  { %v441_v60 = vpop.f32.mrf.mxu1 }
 0x1dc   :  { %v301_v62 = vadd.f32 %v441_v60, %v236_v59  ;;  %v304_v3 = vmax.f32 %v290_v61, 0.0 }
 0x1dd   :  { %v292_v63 = vpop.f32.mrf.mxu1 }
 0x1de   :  { %v307_v1 = vmax.f32 %v301_v62, 0.0  ;;  %v293_v2 = vadd.f32 %v292_v63, %v226_v54 }
 0x1e0   :  { %v309_v4 = vpack.c.bf16 %v307_v1, %v306_v0  ;;  %v305_v5 = vmax.f32 %v293_v2, 0.0 }
 0x1e2   :  { %v308_v7 = vpack.c.bf16 %v305_v5, %v304_v3  ;;  %v316_v9 = vunpack.c.l.bf16 %v309_v4  ;;  %v317_v12 = vunpack.c.h.bf16 %v309_v4 }
 0x1e4   :  { %v314_v10 = vunpack.c.l.bf16 %v308_v7  ;;  %v315_v11 = vunpack.c.h.bf16 %v308_v7  ;;  %v340_v16 = vmul.f32 %v331_v15, %v316_v9  ;;  %v341_v19 = vmul.f32 %v336_v18, %v317_v12 }
 0x1e6   :  { %v338_v13 = vmul.f32 %v321_v6, %v314_v10  ;;  %v339_v14 = vmul.f32 %v326_v8, %v315_v11 }
 0x1e8   :  { %v342_v17 = vadd.f32 %v339_v14, %v338_v13 }
 0x1ea   :  { %v343_v20 = vadd.f32 %v342_v17, %v340_v16 }
 0x1ec   :  { %v344_v22 = vadd.f32 %v343_v20, %v341_v19 }
 0x1ee   :  { %v345_v23 = vrot.slane %v344_v22, 4 }
 0x1f0   :  { %v346_v25 = vadd.f32 %v345_v23, %v344_v22 }
 0x1f2   :  { %v347_v26 = vrot.slane %v346_v25, 2 }
 0x1f4   :  { %v348_v28 = vadd.f32 %v347_v26, %v346_v25 }
 0x1f6   :  { %v349_v30 = vrot.slane %v348_v28, 1 }
 0x1f8   :  { %v350_v32 = vadd.f32 %v349_v30, %v348_v28 }
 0x1fa   :  { %v361_v33 = vadd.f32 %v360_v31, %v350_v32 }
 0x1fc   :  { %v399_v34 = vmul.f32 -1.442695, %v361_v33 }
 0x1fe   :  { %466 = vpow2.f32 %v399_v34 }
 0x20b   :  { %v467_v35 = vpop.eup %466 }
 0x20c   :  { %v365_v36 = vadd.f32 1.0, %v467_v35 }
 0x20e   :  { %468 = vrcp.f32 %v365_v36 }
 0x21b   :  { %v469_v37 = vpop.eup %468 }
 0x21c   :  { %368 = vst [vmem:[#allocation3] sm:$0x1] %v469_v37 }
 0x21d   :  { %481 = shalt.err (!%p478_p4)
}
 0x21e   :  { %378 = dma.vmem_to_hbm [thread:$0]  %s376_s21, 16, %s639_s7, [#allocation4]  }
 0x21f   :  { %490 = dma.done.wait [#allocation4], 16  }
 0x220   :  { %491 = vsyncadd [#allocation4], 4294967280 }
 0x221   :  { %382 = vsyncpa [#allocation4], 1 }

</bundles_post_ra>
